<compile_context>
chip_gen: v7x
topology: tpu7x:2x2x1
jax: 0.10.0
libtpu: 0.0.40
codegen_flags: <defaults>
</compile_context>

<pallas_src>
import jax
import jax.numpy as jnp
from jax.experimental import pallas as pl
from jax.experimental.pallas import tpu as pltpu


def _modal_add_kernel(x_ref, e_ref, o_ref):
    # x_ref: (TM, H) tile of the flattened embeddings
    # e_ref: (1, H)  modality-embedding row (resident across the grid)
    # o_ref: (TM, H) output tile
    o_ref[...] = (x_ref[...] + e_ref[...]).astype(o_ref.dtype)


def _modal_embed_add(x, mod_row, *, tile_m=512):
    """x: (..., H); mod_row: (H,).  Returns x + mod_row (broadcast), same shape/dtype."""
    H = x.shape[-1]
    lead = x.shape[:-1]
    x2d = x.reshape(-1, H)
    M = x2d.shape[0]

    # Tile over rows; keep full H on the lane axis (lane-dense loads/stores).
    TM = min(tile_m, M)
    if TM != M and TM % 8 != 0:
        TM = max(8, (TM // 8) * 8)  # respect the sublane-of-8 tiling constraint
    grid = (pl.cdiv(M, TM),)

    itemsize = jnp.dtype(x2d.dtype).itemsize
    cost = pl.CostEstimate(
        flops=M * H,
        transcendentals=0,
        bytes_accessed=2 * M * H * itemsize + H * jnp.dtype(mod_row.dtype).itemsize,
    )

    out = pl.pallas_call(
        _modal_add_kernel,
        out_shape=jax.ShapeDtypeStruct((M, H), x.dtype),
        grid=grid,
        in_specs=[
            pl.BlockSpec((TM, H), lambda i: (i, 0)),   # x tile, double-buffered
            pl.BlockSpec((1, H), lambda i: (0, 0)),    # modality row, VMEM-resident
        ],
        out_specs=pl.BlockSpec((TM, H), lambda i: (i, 0)),
        compiler_params=pltpu.CompilerParams(
            dimension_semantics=("parallel",),         # shard row tiles on v7x's 2 TCs
            vmem_limit_bytes=64 * 1024 * 1024,         # fits v7x's 64 MiB physical VMEM
        ),
        cost_estimate=cost,
    )(x2d, mod_row.reshape(1, H))

    return out.reshape(lead + (H,))


def modal_embed(poi_embedding, img_embedding, mod_embed_table):
    """Pallas equivalent of ModalEmbed.forward.

    poi_embedding: (B, S_poi, H)
    img_embedding: (B, S_img, H)
    mod_embed_table: (2, H)  -- row 0 = POI modality, row 1 = image modality
    """
    poi_out = _modal_embed_add(poi_embedding, mod_embed_table[0])
    img_out = _modal_embed_add(img_embedding, mod_embed_table[1])
    return poi_out, img_out


if __name__ == "__main__":
    batch, seq_poi, seq_img, hidden = 2, 8, 16, 32

    key = jax.random.PRNGKey(0)
    k_poi, k_img, k_tab = jax.random.split(key, 3)
    poi_embedding = jax.random.normal(k_poi, (batch, seq_poi, hidden), jnp.float32)
    img_embedding = jax.random.normal(k_img, (batch, seq_img, hidden), jnp.float32)
    # nn.Embedding(2, hidden) default init is N(0, 1)
    mod_embed_table = jax.random.normal(k_tab, (2, hidden), jnp.float32)

    poi_out, img_out = modal_embed(poi_embedding, img_embedding, mod_embed_table)
    poi_out = jax.block_until_ready(poi_out)
    img_out = jax.block_until_ready(img_out)

    # plain-JAX reference (matches the PyTorch forward semantics)
    ref_poi = poi_embedding + mod_embed_table[0]
    ref_img = img_embedding + mod_embed_table[1]

    assert poi_out.shape == (batch, seq_poi, hidden)
    assert img_out.shape == (batch, seq_img, hidden)
    assert jnp.allclose(poi_out, ref_poi, atol=1e-6, rtol=1e-6)
    assert jnp.allclose(img_out, ref_img, atol=1e-6, rtol=1e-6)

    print("KERNEL_OK")
</pallas_src>

<mosaic_0001>
module attributes {stable_mosaic.version = 11 : i64} {
  func.func @_modal_add_kernel(%arg0: i32, %arg1: memref<16x32xf32, #tpu.memory_space<vmem>>, %arg2: memref<1x32xf32, #tpu.memory_space<vmem>>, %arg3: memref<16x32xf32, #tpu.memory_space<vmem>>) attributes {dimension_semantics = [#tpu.dimension_semantics<parallel>], iteration_bounds = array<i64: 1>, scalar_prefetch = 0 : i64, scratch_operands = 0 : i64, tpu.core_type = #tpu.core_type<tc>, window_params = [{transform_indices = @transform_0, window_bounds = array<i64: 16, 32>}, {pipeline_mode = #tpu.pipeline_mode<synchronous>, transform_indices = @transform_1, window_bounds = array<i64: 1, 32>}, {transform_indices = @transform_2, window_bounds = array<i64: 16, 32>}]} {
    %c0 = arith.constant 0 : index
    %c0_0 = arith.constant 0 : index
    %0 = vector.load %arg1[%c0, %c0_0] : memref<16x32xf32, #tpu.memory_space<vmem>>, vector<16x32xf32>
    %c0_1 = arith.constant 0 : index
    %c0_2 = arith.constant 0 : index
    %1 = vector.load %arg2[%c0_1, %c0_2] : memref<1x32xf32, #tpu.memory_space<vmem>>, vector<1x32xf32>
    %2 = vector.broadcast %1 : vector<1x32xf32> to vector<16x32xf32>
    %3 = arith.addf %0, %2 : vector<16x32xf32>
    %c0_3 = arith.constant 0 : index
    %c0_4 = arith.constant 0 : index
    %4 = vector.load %arg3[%c0_3, %c0_4] : memref<16x32xf32, #tpu.memory_space<vmem>>, vector<16x32xf32>
    tpu.vector_store %arg3[%c0_3, %c0_4], %3 {strides = array<i32>} : memref<16x32xf32, #tpu.memory_space<vmem>>, vector<16x32xf32>,
    return
  }
  func.func @transform_0(%arg0: i32) -> (i32, i32) {
    %c0_i32 = arith.constant 0 : i32
    %c0_i32_0 = arith.constant 0 : i32
    return %arg0, %c0_i32 : i32, i32
  }
  func.func @transform_1(%arg0: i32) -> (i32, i32) {
    %c0_i32 = arith.constant 0 : i32
    %c0_i32_0 = arith.constant 0 : i32
    %c0_i32_1 = arith.constant 0 : i32
    return %c0_i32, %c0_i32_0 : i32, i32
  }
  func.func @transform_2(%arg0: i32) -> (i32, i32) {
    %c0_i32 = arith.constant 0 : i32
    %c0_i32_0 = arith.constant 0 : i32
    return %arg0, %c0_i32 : i32, i32
  }
}

</mosaic_0001>

<bundles_post_ra>
// kernel: tpu_custom_call.1
= control target key start
LH: loop header
LB: loop body
LE: loop exit
PB: predicated region body
PF: predicated region fallthrough
CT: control target
= control target key end

     0   :  { %7 = vsyncpa [#allocation3], 0  ;;  %s210_s0 = inlined_call_operand.hbm [shape: f32[16,32], index: 0, kind: input, shape index: {}]   ;;  %s211_s1 = inlined_call_operand.hbm [shape: f32[1,32], index: 1, kind: input, shape index: {}]   ;;  %s212_s2 = inlined_call_operand.hbm [shape: f32[16,32], index: 2, kind: output, shape index: {}]  }
   0x1   :  { %8 = vsyncpa [#allocation6], 0 }
   0x2   :  { %9 = vsyncpa [#allocation4], 0  ;;  %s148_s9 = smov [#allocation2]   ;;  %s76_s13 = scalar_lea.hbm %s210_s0, 256 }
   0x3   :  { %s15_s10 = sshll.u32 %s148_s9, 4  ;;  %p77_p0 = scmp.ne.s32.totalorder %s210_s0, %s76_s13  ;;  %s16_s10 = int_to_ptr.vmem [resolvable:$true] %s15_s10 }
   0x4   :  { %p80_p1 = scmp.lt.u32.totalorder %s76_s13, %s210_s0 }
   0x6   :  { %p82_p2 = pnand %p80_p1, %p77_p0 }
   0x8   :  { %85 = shalt.err (!%p82_p2)
}
   0x9   :  { %s86_s18 = scalar_lea.vmem %s16_s10, 256  ;;  %p91_p4 = scmp.lt.s32.totalorder %s16_s10, %s16_s10 }
   0xa   :  { %p87_p3 = scmp.ne.s32.totalorder %s16_s10, %s86_s18  ;;  %p92_p5 = scmp.lt.s32.totalorder %s86_s18, %s86_s18 }
   0xc   :  { %p93_p6 = por %p92_p5, %p91_p4 }
   0xe   :  { %p94_p7 = pnand %p93_p6, %p87_p3 }
  0x10   :  { %97 = shalt.err (!%p94_p7)
}
  0x11   :  { %s149_s19 = smov 128   ;;  %s150_s20 = smov 8  }
  0x12   :  { %21 = dma.hbm_to_vmem [thread:$0]  %s210_s0, 256, %s16_s10, [#allocation3], %s149_s19, %s149_s19, %s150_s20  }
  0x13   :  { %s151_s23 = smov [#allocation5]   ;;  %s98_s27 = scalar_lea.hbm %s211_s1, 16 }
  0x14   :  { %s28_s24 = sshll.u32 %s151_s23, 4  ;;  %p99_p8 = scmp.ne.s32.totalorder %s211_s1, %s98_s27  ;;  %s29_s24 = int_to_ptr.vmem [resolvable:$true] %s28_s24 }
  0x15   :  { %p102_p9 = scmp.lt.u32.totalorder %s98_s27, %s211_s1 }
  0x17   :  { %p104_p10 = pnand %p102_p9, %p99_p8 }
  0x19   :  { %107 = shalt.err (!%p104_p10)
}
  0x1a   :  { %s108_s4 = scalar_lea.vmem %s29_s24, 16  ;;  %s112_s0 = scalar_lea.vmem %s29_s24, 32 }
  0x1b   :  { %p109_p11 = scmp.ne.s32.totalorder %s29_s24, %s108_s4  ;;  %p113_p12 = scmp.lt.s32.totalorder %s29_s24, %s29_s24 }
  0x1c   :  { %p114_p13 = scmp.lt.s32.totalorder %s112_s0, %s108_s4 }
  0x1e   :  { %p115_p0 = por %p114_p13, %p113_p12 }
  0x20   :  { %p116_p1 = pnand %p115_p0, %p109_p11 }
  0x22   :  { %119 = shalt.err (!%p116_p1)
}
  0x23   :  { %31 = dma.hbm_to_vmem [thread:$0]  %s211_s1, 16, %s29_s24, [#allocation6]  }
  0x24   :  { %142 = dma.done.wait [#allocation3], 256  }
  0x25   :  { %143 = vsyncadd [#allocation3], 4294967040 }
  0x26   :  { %144 = dma.done.wait [#allocation6], 16  }
  0x27   :  { %145 = vsyncadd [#allocation6], 4294967280  ;;  %s152_s7 = smov [#allocation7]   ;;  %v38_v0 = vld [vmem:[#allocation2] sm:$0xff]  ;;  %v70_v1 = vld [vmem:[#allocation5] ss:$0 sm:$0xff] }
  0x28   :  { %s57_s8 = sshll.u32 %s152_s7, 4  ;;  %vm49_vm0 = vcmask 261120   ;;  %v39_v2 = vld [vmem:[#allocation2 + $0x8] sm:$0xff]  ;;  %v47_v3 = vadd.f32 %v70_v1, %v38_v0  ;;  %s58_s8 = int_to_ptr.vmem [resolvable:$true] %s57_s8 }
  0x29   :  { %v48_v4 = vadd.f32 %v70_v1, %v39_v2  ;;  %s120_s9 = scalar_lea.vmem %s58_s8, 256  ;;  %p125_p3 = scmp.lt.s32.totalorder %s58_s8, %s58_s8 }
  0x2a   :  { %50 = vst.msk [vmem:[#allocation7] sm:$0xff] %vm49_vm0, %v47_v3  ;;  %p121_p2 = scmp.ne.s32.totalorder %s58_s8, %s120_s9  ;;  %p126_p4 = scmp.lt.s32.totalorder %s120_s9, %s120_s9 }
  0x2b   :  { %51 = vst.msk [vmem:[#allocation7 + $0x8] sm:$0xff] %vm49_vm0, %v48_v4 }
  0x2c   :  { %p127_p5 = por %p126_p4, %p125_p3 }
  0x2e   :  { %p128_p6 = pnand %p127_p5, %p121_p2 }
  0x30   :  { %131 = shalt.err (!%p128_p6)
}
  0x31   :  { %s132_s11 = scalar_lea.hbm %s212_s2, 256 }
  0x32   :  { %p133_p7 = scmp.ne.s32.totalorder %s212_s2, %s132_s11  ;;  %p136_p8 = scmp.lt.u32.totalorder %s132_s11, %s212_s2 }
  0x34   :  { %p138_p9 = pnand %p136_p8, %p133_p7 }
  0x36   :  { %141 = shalt.err (!%p138_p9)
}
  0x37   :  { %63 = dma.vmem_to_hbm [thread:$0]  %s58_s8, 256, %s212_s2, [#allocation4], %s149_s19, %s149_s19, %s150_s20  }
  0x38   :  { %146 = dma.done.wait [#allocation4], 256  }
  0x39   :  { %147 = vsyncadd [#allocation4], 4294967040 }
  0x3a   :  { %67 = vsyncpa [#allocation3], 1 }
  0x3b   :  { %68 = vsyncpa [#allocation6], 1 }
  0x3c   :  { %69 = vsyncpa [#allocation4], 1 }

</bundles_post_ra>
